<compile_context>
chip_gen: v5e
topology: v5e:2x2
jax: 0.10.0
libtpu: 0.0.40
codegen_flags: <defaults>
</compile_context>

<pallas_src>
import functools

import jax
import jax.numpy as jnp
from jax.experimental import pallas as pl
from jax.experimental.pallas import tpu as pltpu

_LANES = 128       # TPU vreg lane width
_TB = 512          # batch-tile (packed rows) when gridding over batch


def _flow_kernel(x_ref, w_ref, b_ref, o_ref, *, n_flows: int):
    """Applies x <- x @ W' + b, n_flows times (W' has the residual folded in)."""
    x = x_ref[...].astype(jnp.float32)                               # (TB, N)
    w = w_ref[...].astype(jnp.float32)                               # (N, N)
    bb = jnp.broadcast_to(b_ref[...].astype(jnp.float32), x.shape)   # hoisted once
    for _ in range(n_flows):                                         # static unroll
        x = jnp.dot(x, w, preferred_element_type=jnp.float32) + bb
    o_ref[...] = x.astype(o_ref.dtype)
    # TODO(synk): forward() also appends det-of-Jacobian terms per flow step
    # (self.jacobian(x) is called with a missing arg in the reference, so it
    # would raise); it has no clean Pallas equivalent and does not affect the
    # returned tensor.


@functools.partial(jax.jit, static_argnums=3)
def normalizing_flow_forward(x, w, b, n_flows: int):
    """x: (B, D) f32, w: (D, D) PyTorch Linear weight (out,in), b: (D,)."""
    B, D = x.shape
    assert w.shape == (D, D) and b.shape == (D,)

    # Fold the residual into the weight:  x + x @ W^T + b == x @ (W^T + I) + b.
    wt = jnp.transpose(w) + jnp.eye(D, dtype=w.dtype)       # (in, out) + I

    # Lane packing: put P = 128 // D feature groups side by side so every vreg
    # lane (and the MXU contraction/output width) is fully used.
    if D < _LANES and _LANES % D == 0 and B % (_LANES // D) == 0:
        P = _LANES // D
    else:
        P = 1
    N = P * D
    Bp = B // P

    x_p = x.reshape(Bp, N)
    w_p = jnp.kron(jnp.eye(P, dtype=wt.dtype), wt)          # block-diagonal (N, N)
    b_p = jnp.tile(b, P).reshape(1, N)

    kernel = functools.partial(_flow_kernel, n_flows=n_flows)

    if Bp <= _TB:
        # Tiny problem: single invocation, no grid, whole arrays in VMEM.
        out = pl.pallas_call(
            kernel,
            out_shape=jax.ShapeDtypeStruct((Bp, N), x.dtype),
        )(x_p, w_p, b_p)
    else:
        # Larger batches: tile the packed batch dim; weight & bias stay resident
        # (constant block index => no re-DMA across iterations).
        grid = (pl.cdiv(Bp, _TB),)
        out = pl.pallas_call(
            kernel,
            out_shape=jax.ShapeDtypeStruct((Bp, N), x.dtype),
            grid=grid,
            in_specs=[
                pl.BlockSpec((_TB, N), lambda i: (i, 0)),
                pl.BlockSpec((N, N), lambda i: (0, 0)),
                pl.BlockSpec((1, N), lambda i: (0, 0)),
            ],
            out_specs=pl.BlockSpec((_TB, N), lambda i: (i, 0)),
            compiler_params=pltpu.CompilerParams(
                dimension_semantics=("parallel",)),
        )(x_p, w_p, b_p)

    return out.reshape(B, D)


def _reference(x, w, b, n_flows: int):
    for _ in range(n_flows):
        x = x + x @ w.T + b
    return x


if __name__ == "__main__":
    # Module config: n_flows=3, in_dim=out_dim=32 (residual add requires in==out).
    n_flows = 3
    in_dim = out_dim = 32
    batch = 8

    key = jax.random.PRNGKey(0)
    kx, kw, kb = jax.random.split(key, 3)

    # Deterministic PyTorch-Linear-style init: U(-1/sqrt(in_dim), 1/sqrt(in_dim)).
    bound = 1.0 / (in_dim ** 0.5)
    w = jax.random.uniform(kw, (out_dim, in_dim), jnp.float32, -bound, bound)
    b = jax.random.uniform(kb, (out_dim,), jnp.float32, -bound, bound)
    x = jax.random.normal(kx, (batch, in_dim), jnp.float32)

    # Small case (single-invocation, lane-packed path).
    out = jax.block_until_ready(normalizing_flow_forward(x, w, b, n_flows))
    ref = _reference(x, w, b, n_flows)
    assert out.shape == (batch, out_dim)
    assert jnp.allclose(out, ref, atol=1e-4, rtol=1e-4), "mismatch vs reference (small)"

    # Larger batch exercises the parallel batch-tiled grid path.
    big_batch = 4096
    xb = jax.random.normal(kx, (big_batch, in_dim), jnp.float32)
    out_b = jax.block_until_ready(normalizing_flow_forward(xb, w, b, n_flows))
    ref_b = _reference(xb, w, b, n_flows)
    assert out_b.shape == (big_batch, out_dim)
    assert jnp.allclose(out_b, ref_b, atol=1e-4, rtol=1e-4), "mismatch vs reference (big)"

    print("KERNEL_OK")
</pallas_src>

<mosaic_0001>
module attributes {stable_mosaic.version = 11 : i64} {
  func.func @_flow_kernel(%arg0: memref<2x128xf32, #tpu.memory_space<vmem>>, %arg1: memref<128x128xf32, #tpu.memory_space<vmem>>, %arg2: memref<1x128xf32, #tpu.memory_space<vmem>>, %arg3: memref<2x128xf32, #tpu.memory_space<vmem>>) attributes {dimension_semantics = [], scalar_prefetch = 0 : i64, scratch_operands = 0 : i64, tpu.core_type = #tpu.core_type<tc>} {
    %c0 = arith.constant 0 : index
    %c0_0 = arith.constant 0 : index
    %0 = vector.load %arg0[%c0, %c0_0] : memref<2x128xf32, #tpu.memory_space<vmem>>, vector<2x128xf32>
    %c0_1 = arith.constant 0 : index
    %c0_2 = arith.constant 0 : index
    %1 = vector.load %arg1[%c0_1, %c0_2] : memref<128x128xf32, #tpu.memory_space<vmem>>, vector<128x128xf32>
    %c0_3 = arith.constant 0 : index
    %c0_4 = arith.constant 0 : index
    %2 = vector.load %arg2[%c0_3, %c0_4] : memref<1x128xf32, #tpu.memory_space<vmem>>, vector<1x128xf32>
    %3 = vector.shape_cast %2 : vector<1x128xf32> to vector<1x128xf32>
    %4 = vector.broadcast %3 : vector<1x128xf32> to vector<2x128xf32>
    %cst = arith.constant dense<0.000000e+00> : vector<2x128xf32>
    %5 = tpu.matmul %0, %1, %cst {dimension_numbers = #tpu.dot_dimension_numbers<[1], [0], [0], [1], [0, 0, 1, 1], [], []>} : vector<2x128xf32>, vector<128x128xf32>, vector<2x128xf32> -> vector<2x128xf32>
    %6 = arith.addf %5, %4 : vector<2x128xf32>
    %cst_5 = arith.constant dense<0.000000e+00> : vector<2x128xf32>
    %7 = tpu.matmul %6, %1, %cst_5 {dimension_numbers = #tpu.dot_dimension_numbers<[1], [0], [0], [1], [0, 0, 1, 1], [], []>} : vector<2x128xf32>, vector<128x128xf32>, vector<2x128xf32> -> vector<2x128xf32>
    %8 = arith.addf %7, %4 : vector<2x128xf32>
    %cst_6 = arith.constant dense<0.000000e+00> : vector<2x128xf32>
    %9 = tpu.matmul %8, %1, %cst_6 {dimension_numbers = #tpu.dot_dimension_numbers<[1], [0], [0], [1], [0, 0, 1, 1], [], []>} : vector<2x128xf32>, vector<128x128xf32>, vector<2x128xf32> -> vector<2x128xf32>
    %10 = arith.addf %9, %4 : vector<2x128xf32>
    %c0_7 = arith.constant 0 : index
    %c0_8 = arith.constant 0 : index
    %11 = vector.load %arg3[%c0_7, %c0_8] : memref<2x128xf32, #tpu.memory_space<vmem>>, vector<2x128xf32>
    tpu.vector_store %arg3[%c0_7, %c0_8], %10 {strides = array<i32>} : memref<2x128xf32, #tpu.memory_space<vmem>>, vector<2x128xf32>,
    return
  }
}

</mosaic_0001>

<bundles_post_ra>
// kernel: tile.8
= control target key start
LH: loop header
LB: loop body
LE: loop exit
PB: predicated region body
PF: predicated region fallthrough
CT: control target
= control target key end

     0   :  { %s22_s0 = inlined_call_operand.vmem [shape: f32[32], index: 0, kind: input, shape index: {}]   ;;  %s23_s1 = inlined_call_operand.vmem [shape: f32[4,32], index: 1, kind: output, shape index: {}]  }
   0x1   :  { %v4_v0 = vld [vmem:[%s22_s0] ss:$0 sm:$0xff] }
   0x2   :  { %5 = vst [vmem:[%s23_s1] sm:$0xf] %v4_v0 }

// kernel: tile.9
= control target key start
LH: loop header
LB: loop body
LE: loop exit
PB: predicated region body
PF: predicated region fallthrough
CT: control target
= control target key end

     0   :  { %s37_s8 = smov 32   ;;  %s38_s9 = smov 64   ;;  %vm7_vm0 = vcmask 261120   ;;  %vm13_vm1 = vcmask 1048320   ;;  %vm19_vm2 = vcmask 785920   ;;  %vm25_vm3 = vcmask 523520   ;;  %s55_s0 = inlined_call_operand.vmem [shape: f32[4,32], index: 0, kind: input, shape index: {}]   ;;  %s56_s1 = inlined_call_operand.vmem [shape: f32[1,128], index: 1, kind: output, shape index: {}]  }
   0x1   :  { %v4_v0 = vld [vmem:[%s55_s0] sm:$0xf]  ;;  %s36_s0 = smov 96  }
   0x2   :  { %5 = vst [vmem:[#allocation1] sm:$0xf] %v4_v0 }
   0x9   :  { %v10_v1 = vld [vmem:[#allocation1 + $0x3] sm:$0x1]   ;;  %v22_v2 = vld [vmem:[#allocation1 + $0x1] sm:$0x1]   ;;  %v16_v3 = vld [vmem:[#allocation1 + $0x2] sm:$0x1]  }
   0xa   :  { %11 = vrot.lane.b32.xlu0 %v10_v1, %s36_s0  ;;  %23 = vrot.lane.b32.xlu1 %v22_v2, %s37_s8  ;;  %v6_v4 = vld [vmem:[#allocation1] sm:$0x1]  }
   0xb   :  { %8 = vst.msk [vmem:[#allocation0] sm:$0x1] %vm7_vm0, %v6_v4  }
  0x12   :  { %17 = vrot.lane.b32.xlu0 %v16_v3, %s38_s9 }
  0x7c   :  { %v12_v5 = vpop.permute.xlu0 %11   ;;  %v24_v6 = vpop.permute.xlu1 %23  }
  0x7d   :  { %14 = vst.msk [vmem:[#allocation0] sm:$0x1] %vm13_vm1, %v12_v5  }
  0x84   :  { %v18_v7 = vpop.permute.xlu0 %17  }
  0x85   :  { %20 = vst.msk [vmem:[#allocation0] sm:$0x1] %vm19_vm2, %v18_v7  }
  0x86   :  { %26 = vst.msk [vmem:[#allocation0] sm:$0x1] %vm25_vm3, %v24_v6  }
  0x8d   :  { %v29_v8 = vld [vmem:[#allocation0] sm:$0x1] }
  0x8e   :  { %32 = vst [vmem:[%s56_s1] sm:$0x1] %v29_v8 }

// kernel: normalizing_flow_forward.1
= control target key start
LH: loop header
LB: loop body
LE: loop exit
PB: predicated region body
PF: predicated region fallthrough
CT: control target
= control target key end

     0   :  { %s178_s1 = inlined_call_operand.vmem [shape: f32[128,128], index: 1, kind: input, shape index: {}]   ;;  %s179_s2 = inlined_call_operand.vmem [shape: f32[1,128], index: 2, kind: input, shape index: {}]   ;;  %s180_s0 = inlined_call_operand.vmem [shape: f32[2,128], index: 0, kind: input, shape index: {}]   ;;  %s181_s3 = inlined_call_operand.vmem [shape: f32[2,128], index: 3, kind: output, shape index: {}]  }
   0x1   :  { %v30_v0 = vld [vmem:[%s178_s1 + $0x78] sm:$0xff]  ;;  %v29_v1 = vld [vmem:[%s178_s1 + $0x70] sm:$0xff]  ;;  %v28_v2 = vld [vmem:[%s178_s1 + $0x68] sm:$0xff] }
   0x2   :  { %35 = vmatpush.msra.mxu0 %v30_v0  ;;  %55 = vmatpush.msra.mxu1 %v30_v0  ;;  %v27_v3 = vld [vmem:[%s178_s1 + $0x60] sm:$0xff]  ;;  %v26_v4 = vld [vmem:[%s178_s1 + $0x58] sm:$0xff]  ;;  %v25_v5 = vld [vmem:[%s178_s1 + $0x50] sm:$0xff] }
   0x3   :  { %75 = vmatpush.msra.mxu2 %v30_v0  ;;  %v24_v6 = vld [vmem:[%s178_s1 + $0x48] sm:$0xff]  ;;  %v23_v7 = vld [vmem:[%s178_s1 + $0x40] sm:$0xff]  ;;  %v22_v8 = vld [vmem:[%s178_s1 + $0x38] sm:$0xff] }
   0x4   :  { %36 = vmatpush.msra.mxu0 %v29_v1  ;;  %56 = vmatpush.msra.mxu1 %v29_v1  ;;  %v21_v9 = vld [vmem:[%s178_s1 + $0x30] sm:$0xff]  ;;  %v20_v10 = vld [vmem:[%s178_s1 + $0x28] sm:$0xff]  ;;  %v19_v11 = vld [vmem:[%s178_s1 + $0x20] sm:$0xff] }
   0x5   :  { %76 = vmatpush.msra.mxu2 %v29_v1  ;;  %v18_v12 = vld [vmem:[%s178_s1 + $0x18] sm:$0xff]  ;;  %v17_v13 = vld [vmem:[%s178_s1 + $0x10] sm:$0xff]  ;;  %v16_v14 = vld [vmem:[%s178_s1 + $0x8] sm:$0xff] }
   0x6   :  { %37 = vmatpush.msra.mxu0 %v28_v2  ;;  %57 = vmatpush.msra.mxu1 %v28_v2  ;;  %v15_v15 = vld [vmem:[%s178_s1] sm:$0xff] }
   0x7   :  { %77 = vmatpush.msra.mxu2 %v28_v2  ;;  %v14_v16 = vld [vmem:[%s180_s0] sm:$0x3] }
   0x8   :  { %38 = vmatpush.msra.mxu0 %v27_v3  ;;  %58 = vmatpush.msra.mxu1 %v27_v3  ;;  %v100_v17 = vld [vmem:[%s179_s2] ss:$0 sm:$0xff] }
   0x9   :  { %78 = vmatpush.msra.mxu2 %v27_v3 }
   0xa   :  { %39 = vmatpush.msra.mxu0 %v26_v4  ;;  %59 = vmatpush.msra.mxu1 %v26_v4 }
   0xb   :  { %79 = vmatpush.msra.mxu2 %v26_v4 }
   0xc   :  { %40 = vmatpush.msra.mxu0 %v25_v5  ;;  %60 = vmatpush.msra.mxu1 %v25_v5 }
   0xd   :  { %80 = vmatpush.msra.mxu2 %v25_v5 }
   0xe   :  { %41 = vmatpush.msra.mxu0 %v24_v6  ;;  %61 = vmatpush.msra.mxu1 %v24_v6 }
   0xf   :  { %81 = vmatpush.msra.mxu2 %v24_v6 }
  0x10   :  { %42 = vmatpush.msra.mxu0 %v23_v7  ;;  %62 = vmatpush.msra.mxu1 %v23_v7 }
  0x11   :  { %82 = vmatpush.msra.mxu2 %v23_v7 }
  0x12   :  { %43 = vmatpush.msra.mxu0 %v22_v8  ;;  %63 = vmatpush.msra.mxu1 %v22_v8 }
  0x13   :  { %83 = vmatpush.msra.mxu2 %v22_v8 }
  0x14   :  { %44 = vmatpush.msra.mxu0 %v21_v9  ;;  %64 = vmatpush.msra.mxu1 %v21_v9 }
  0x15   :  { %84 = vmatpush.msra.mxu2 %v21_v9 }
  0x16   :  { %45 = vmatpush.msra.mxu0 %v20_v10  ;;  %65 = vmatpush.msra.mxu1 %v20_v10 }
  0x17   :  { %85 = vmatpush.msra.mxu2 %v20_v10 }
  0x18   :  { %46 = vmatpush.msra.mxu0 %v19_v11  ;;  %66 = vmatpush.msra.mxu1 %v19_v11 }
  0x19   :  { %86 = vmatpush.msra.mxu2 %v19_v11 }
  0x1a   :  { %47 = vmatpush.msra.mxu0 %v18_v12  ;;  %67 = vmatpush.msra.mxu1 %v18_v12 }
  0x1b   :  { %87 = vmatpush.msra.mxu2 %v18_v12 }
  0x1c   :  { %48 = vmatpush.msra.mxu0 %v17_v13  ;;  %68 = vmatpush.msra.mxu1 %v17_v13 }
  0x1d   :  { %88 = vmatpush.msra.mxu2 %v17_v13 }
  0x1e   :  { %49 = vmatpush.msra.mxu0 %v16_v14  ;;  %69 = vmatpush.msra.mxu1 %v16_v14 }
  0x1f   :  { %89 = vmatpush.msra.mxu2 %v16_v14 }
  0x20   :  { %50 = vmatpush.msra.mxu0 %v15_v15  ;;  %70 = vmatpush.msra.mxu1 %v15_v15 }
  0x21   :  { %51 = vmatmul.f32.vlgmr.msra.gmra.mxu0 %v14_v16  ;;  %90 = vmatpush.msra.mxu2 %v15_v15 }
  0x9e   :  { %v52_v18 = vpop.f32.mrf.mxu0 }
  0x9f   :  { %v53_v19 = vadd.f32 %v100_v17, %v52_v18 }
  0xa1   :  { %71 = vmatmul.f32.vlgmr.msra.gmra.mxu1 %v53_v19 }
 0x11e   :  { %v72_v20 = vpop.f32.mrf.mxu1 }
 0x11f   :  { %v73_v21 = vadd.f32 %v100_v17, %v72_v20 }
 0x121   :  { %91 = vmatmul.f32.vlgmr.msra.gmra.mxu2 %v73_v21 }
 0x1a4   :  { %v92_v22 = vpop.f32.mrf.mxu2 }
 0x1a5   :  { %v93_v23 = vadd.f32 %v100_v17, %v92_v22 }
 0x1a7   :  { %95 = vst [vmem:[%s181_s3] sm:$0x3] %v93_v23 }

</bundles_post_ra>
